<compile_context>
chip_gen: v5e
topology: v5e:2x2
jax: 0.10.0
libtpu: 0.0.40
codegen_flags: <defaults>
</compile_context>

<pallas_src>
import jax
import jax.numpy as jnp
from jax import lax
from jax.experimental import pallas as pl
from jax.experimental.pallas import tpu as pltpu


def _pam_kernel(xf_ref, w_ref, b_ref, energy_ref, qk_ref):
    """Grid = (batch, energy-column-tile).

    xf_ref     : (1, C, HW)   bf16  x, spatially flattened (HW on lanes)
    w_ref      : (2*Cq, C)    bf16  stacked [wq; wk]
    b_ref      : (2*Cq, 1)    f32   stacked [bq; bk] (column vector)
    energy_ref : (1, HW, TN)  f32   output energy column tile
    qk_ref     : (2*Cq, HW)   f32   VMEM scratch holding q (rows :Cq) and
                                    k (rows Cq:) for the current batch element
    """
    col = pl.program_id(1)
    cq2, _ = qk_ref.shape
    cq = cq2 // 2
    tn = energy_ref.shape[-1]

    # Project q and k once per batch element; the column axis is "arbitrary"
    # so the scratch stays valid across the column sweep.
    @pl.when(col == 0)
    def _():
        qk_ref[...] = (
            jnp.dot(w_ref[...], xf_ref[0], preferred_element_type=jnp.float32)
            + b_ref[...]
        )

    q = qk_ref[pl.ds(0, cq), :]                       # (Cq, HW)

    start = col * tn
    if tn % 128 == 0:
        start = pl.multiple_of(start, 128)
    k = qk_ref[pl.ds(cq, cq), pl.ds(start, tn)]       # (Cq, TN)

    # energy[i, j] = sum_o q[o, i] * k[o, j]  -> lane-dense (HW, TN) tile.
    energy_ref[0] = lax.dot_general(
        q, k,
        dimension_numbers=(((0,), (0,)), ((), ())),
        preferred_element_type=jnp.float32,
    )


def pam_module_forward(x, wq, bq, wk, bk, *, tn=None):
    """PAM_Module.forward. x: (B, C, H, W) -> energy: (B, H*W, H*W) f32."""
    B, C, H, W = x.shape
    HW = H * W
    Cq = wq.shape[0]

    # Single lane-dense layout of x; no extra transpose pass over HBM.
    xf = x.reshape(B, C, HW).astype(jnp.bfloat16)                   # (B, C, HW)
    # Stack the two 1x1-conv weights so the projection is one matmul.
    w_qk = jnp.concatenate([wq, wk], axis=0).astype(jnp.bfloat16)   # (2Cq, C)
    b_qk = jnp.concatenate([bq, bk], axis=0).astype(jnp.float32)
    b_qk = b_qk.reshape(2 * Cq, 1)                                  # (2Cq, 1)

    # Column tile of the energy output: lane-dense (multiple of 128), sized so
    # the double-buffered (HW, TN) f32 output block stays comfortably within
    # scoped VMEM on all generations (shrink further for very large HW on v7x).
    if tn is None:
        tn = HW
        if HW % 128 == 0:
            for cand in (512, 384, 256, 128):
                if HW % cand == 0:
                    tn = cand
                    break
    assert HW % tn == 0, (HW, tn)
    n_col = HW // tn

    flops = B * (2 * (2 * Cq) * C * HW      # stacked q/k projection
                 + 2 * HW * HW * Cq)        # energy
    bytes_accessed = (2 * B * C * HW        # bf16 x reads
                      + 2 * (2 * Cq * C)    # bf16 stacked weights
                      + 4 * (2 * Cq)        # f32 biases
                      + 4 * B * HW * HW)    # f32 energy writeback (dominant)

    energy = pl.pallas_call(
        _pam_kernel,
        out_shape=jax.ShapeDtypeStruct((B, HW, HW), jnp.float32),
        grid_spec=pltpu.PrefetchScalarGridSpec(
            num_scalar_prefetch=0,
            grid=(B, n_col),
            in_specs=[
                # index_maps independent of the column index -> blocks stay
                # resident across the inner column sweep (no re-DMA of x).
                pl.BlockSpec((1, C, HW), lambda b, j: (b, 0, 0)),
                pl.BlockSpec((2 * Cq, C), lambda b, j: (0, 0)),
                pl.BlockSpec((2 * Cq, 1), lambda b, j: (0, 0)),
            ],
            out_specs=pl.BlockSpec((1, HW, tn), lambda b, j: (b, 0, j)),
            scratch_shapes=[pltpu.VMEM((2 * Cq, HW), jnp.float32)],
        ),
        compiler_params=pltpu.CompilerParams(
            dimension_semantics=("parallel", "arbitrary"),
        ),
        cost_estimate=pl.CostEstimate(
            flops=flops, transcendentals=0, bytes_accessed=bytes_accessed
        ),
    )(xf, w_qk, b_qk)
    return energy


def _reference(x, wq, bq, wk, bk, *, bf16_inputs=False):
    """Pure-JAX reference mirroring the PyTorch PAM_Module forward."""
    B, C, H, W = x.shape
    HW = H * W
    dt = jnp.bfloat16 if bf16_inputs else jnp.float32
    xf = x.reshape(B, C, HW).astype(dt)
    hp = lax.Precision.HIGHEST
    q = jnp.einsum("oc,bcj->boj", wq.astype(dt), xf,
                   preferred_element_type=jnp.float32,
                   precision=hp) + bq[None, :, None]
    k = jnp.einsum("oc,bcj->boj", wk.astype(dt), xf,
                   preferred_element_type=jnp.float32,
                   precision=hp) + bk[None, :, None]
    energy = jnp.einsum("boi,boj->bij", q, k, precision=hp)
    return energy


if __name__ == "__main__":
    # Shapes consistent with PAM_Module(in_planes=32) on a 16x16 feature map.
    B, C, H, W = 2, 32, 16, 16
    Cq = C // 8  # query/key channels

    key = jax.random.PRNGKey(0)
    kx, kwq, kbq, kwk, kbk = jax.random.split(key, 5)

    x = jax.random.normal(kx, (B, C, H, W), dtype=jnp.float32)
    # Deterministic synthetic parameters for the 1x1 query_conv / key_conv.
    wq = jax.random.normal(kwq, (Cq, C), dtype=jnp.float32) * 0.1
    bq = jax.random.normal(kbq, (Cq,), dtype=jnp.float32) * 0.1
    wk = jax.random.normal(kwk, (Cq, C), dtype=jnp.float32) * 0.1
    bk = jax.random.normal(kbk, (Cq,), dtype=jnp.float32) * 0.1

    # tn=128 forces two column tiles per batch so the scratch-reuse
    # (@pl.when(col == 0)) path is exercised even at this demo scale.
    out = jax.block_until_ready(pam_module_forward(x, wq, bq, wk, bk, tn=128))
    assert out.shape == (B, H * W, H * W), out.shape

    # Tight check against a reference that quantizes inputs to bf16 like the
    # kernel (f32 accumulation), and a looser sanity check against the exact
    # f32 PyTorch-equivalent forward (difference is bf16-input-level only).
    ref_bf16 = _reference(x, wq, bq, wk, bk, bf16_inputs=True)
    ref_f32 = _reference(x, wq, bq, wk, bk, bf16_inputs=False)
    assert jnp.allclose(out, ref_bf16, rtol=1e-2, atol=1e-2), float(
        jnp.max(jnp.abs(out - ref_bf16))
    )
    assert jnp.allclose(out, ref_f32, rtol=5e-2, atol=5e-2), float(
        jnp.max(jnp.abs(out - ref_f32))
    )

    print("KERNEL_OK")
</pallas_src>

<mosaic_0001>
module attributes {stable_mosaic.version = 11 : i64} {
  func.func @_pam_kernel(%arg0: i32, %arg1: i32, %arg2: memref<1x32x256xbf16, #tpu.memory_space<vmem>>, %arg3: memref<8x32xbf16, #tpu.memory_space<vmem>>, %arg4: memref<8x1xf32, #tpu.memory_space<vmem>>, %arg5: memref<1x256x128xf32, #tpu.memory_space<vmem>>, %arg6: memref<8x256xf32, #tpu.memory_space<vmem>>) attributes {dimension_semantics = [#tpu.dimension_semantics<parallel>, #tpu.dimension_semantics<arbitrary>], iteration_bounds = array<i64: 2, 2>, scalar_prefetch = 0 : i64, scratch_operands = 1 : i64, tpu.core_type = #tpu.core_type<tc>, window_params = [{transform_indices = @transform_0, window_bounds = array<i64: 1, 32, 256>}, {pipeline_mode = #tpu.pipeline_mode<synchronous>, transform_indices = @transform_1, window_bounds = array<i64: 8, 32>}, {pipeline_mode = #tpu.pipeline_mode<synchronous>, transform_indices = @transform_2, window_bounds = array<i64: 8, 1>}, {transform_indices = @transform_3, window_bounds = array<i64: 1, 256, 128>}]} {
    %c0_i32 = arith.constant 0 : i32
    %0 = arith.cmpi eq, %arg1, %c0_i32 : i32
    %1 = arith.extui %0 : i1 to i32
    %c0_i32_0 = arith.constant 0 : i32
    %2 = arith.cmpi ne, %1, %c0_i32_0 : i32
    scf.if %2 {
      %c0_5 = arith.constant 0 : index
      %c0_6 = arith.constant 0 : index
      %12 = vector.load %arg3[%c0_5, %c0_6] : memref<8x32xbf16, #tpu.memory_space<vmem>>, vector<8x32xbf16>
      %c0_7 = arith.constant 0 : index
      %c0_8 = arith.constant 0 : index
      %c0_9 = arith.constant 0 : index
      %13 = vector.load %arg2[%c0_7, %c0_8, %c0_9] : memref<1x32x256xbf16, #tpu.memory_space<vmem>>, vector<1x32x256xbf16>
      %14 = vector.shape_cast %13 : vector<1x32x256xbf16> to vector<32x256xbf16>
      %cst_10 = arith.constant dense<0.000000e+00> : vector<8x256xf32>
      %15 = tpu.matmul %12, %14, %cst_10 {dimension_numbers = #tpu.dot_dimension_numbers<[1], [0], [0], [1], [0, 0, 1, 1], [], []>} : vector<8x32xbf16>, vector<32x256xbf16>, vector<8x256xf32> -> vector<8x256xf32>
      %c0_11 = arith.constant 0 : index
      %c0_12 = arith.constant 0 : index
      %16 = vector.load %arg4[%c0_11, %c0_12] : memref<8x1xf32, #tpu.memory_space<vmem>>, vector<8x1xf32>
      %17 = vector.broadcast %16 : vector<8x1xf32> to vector<8x256xf32>
      %18 = arith.addf %15, %17 : vector<8x256xf32>
      %c0_13 = arith.constant 0 : index
      %c0_14 = arith.constant 0 : index
      %19 = vector.load %arg6[%c0_13, %c0_14] : memref<8x256xf32, #tpu.memory_space<vmem>>, vector<8x256xf32>
      tpu.vector_store %arg6[%c0_13, %c0_14], %18 {strides = array<i32>} : memref<8x256xf32, #tpu.memory_space<vmem>>, vector<8x256xf32>,
    } else {
    }
    %c0 = arith.constant 0 : index
    %c0_1 = arith.constant 0 : index
    %3 = vector.load %arg6[%c0, %c0_1] : memref<8x256xf32, #tpu.memory_space<vmem>>, vector<4x256xf32>
    %c128_i32 = arith.constant 128 : i32
    %4 = arith.muli %arg1, %c128_i32 : i32
    %5 = tpu.assume_multiple %4, 128 : i32
    %c4 = arith.constant 4 : index
    %6 = arith.index_cast %5 : i32 to index
    %7 = vector.load %arg6[%c4, %6] : memref<8x256xf32, #tpu.memory_space<vmem>>, vector<4x128xf32>
    %cst = arith.constant dense<0.000000e+00> : vector<256x128xf32>
    %8 = tpu.matmul %3, %7, %cst {dimension_numbers = #tpu.dot_dimension_numbers<[0], [0], [1], [1], [0, 1, 1, 1], [], []>} : vector<4x256xf32>, vector<4x128xf32>, vector<256x128xf32> -> vector<256x128xf32>
    %c0_2 = arith.constant 0 : index
    %c0_3 = arith.constant 0 : index
    %c0_4 = arith.constant 0 : index
    %9 = vector.load %arg5[%c0_2, %c0_3, %c0_4] : memref<1x256x128xf32, #tpu.memory_space<vmem>>, vector<1x256x128xf32>
    %10 = vector.shape_cast %9 : vector<1x256x128xf32> to vector<256x128xf32>
    %11 = vector.shape_cast %8 : vector<256x128xf32> to vector<1x256x128xf32>
    tpu.vector_store %arg5[%c0_2, %c0_3, %c0_4], %11 {strides = array<i32>} : memref<1x256x128xf32, #tpu.memory_space<vmem>>, vector<1x256x128xf32>,
    return
  }
  func.func @transform_0(%arg0: i32, %arg1: i32) -> (i32, i32, i32) {
    %c0_i32 = arith.constant 0 : i32
    %c0_i32_0 = arith.constant 0 : i32
    %c0_i32_1 = arith.constant 0 : i32
    return %arg0, %c0_i32, %c0_i32_0 : i32, i32, i32
  }
  func.func @transform_1(%arg0: i32, %arg1: i32) -> (i32, i32) {
    %c0_i32 = arith.constant 0 : i32
    %c0_i32_0 = arith.constant 0 : i32
    %c0_i32_1 = arith.constant 0 : i32
    return %c0_i32, %c0_i32_0 : i32, i32
  }
  func.func @transform_2(%arg0: i32, %arg1: i32) -> (i32, i32) {
    %c0_i32 = arith.constant 0 : i32
    %c0_i32_0 = arith.constant 0 : i32
    %c0_i32_1 = arith.constant 0 : i32
    return %c0_i32, %c0_i32_0 : i32, i32
  }
  func.func @transform_3(%arg0: i32, %arg1: i32) -> (i32, i32, i32) {
    %c0_i32 = arith.constant 0 : i32
    %c0_i32_0 = arith.constant 0 : i32
    return %arg0, %c0_i32, %arg1 : i32, i32, i32
  }
}

</mosaic_0001>

<bundles_post_ra>
// kernel: tpu_custom_call.1
= control target key start
LH: loop header
LB: loop body
LE: loop exit
PB: predicated region body
PF: predicated region fallthrough
CT: control target
= control target key end

     0   :  { %8 = vsyncpa [#allocation4], 0  ;;  %s1309_s0 = inlined_call_operand.hbm [shape: bf16[2,32,256], index: 0, kind: input, shape index: {}]   ;;  %s1310_s1 = inlined_call_operand.vmem [shape: bf16[8,32], index: 1, kind: input, shape index: {}]   ;;  %s1311_s2 = inlined_call_operand.vmem [shape: f32[8,1], index: 2, kind: input, shape index: {}]   ;;  %s1312_s3 = inlined_call_operand.hbm [shape: f32[2,256,256], index: 3, kind: output, shape index: {}]  }
   0x1   :  { %10 = vsyncpa [#allocation4 + $0x1], 0 }
   0x2   :  { %11 = vsyncpa [#allocation5], 0 }
   0x3   :  { %13 = vsyncpa [#allocation5 + $0x1], 0  ;;  %s1064_s12 = smov 0   ;;  %s1066_s13 = smov 0  }
   0x4   :  { %s1068_s14 = smov 0   ;;  %s1070_s15 = smov 0  }
   0x5   :  { %s1072_s16 = smov 0   ;;  %s1074_s17 = smov 0  }
   0x6   :  { %s1076_s18 = smov 0   ;;  %s1078_s19 = smov 0  }
   0x7   :  { %s1080_s20 = smov 0   ;;  %s1082_s21 = smov 0  }
   0x8   :  { %s1084_s22 = smov 0  }
   0x9 LB: > { %1317 = sst [smem:[#allocation9_spill]] %s1028_s20  ;;  %s697_s23 = sadd.s32 4294967295, %s1036_s22   ;;  %s1036_s22 = sphi %s1084_s22, %s19_s22   ;;  %s1032_s21 = sphi %s1082_s21, %s1328_s21   ;;  %s1028_s20 = sphi %s1080_s20, %s1327_s20   ;;  %s1024_s19 = sphi %s1078_s19, %s1326_s19   ;;  %s1020_s18 = sphi %s1076_s18, %s1325_s18   ;;  %s1016_s17 = sphi %s1074_s17, %s1334_s17   ;;  %s1012_s16 = sphi %s1072_s16, %s1333_s16   ;;  %s1008_s15 = sphi %s1070_s15, %s1332_s15   ;;  %s1004_s14 = sphi %s1068_s14, %s1331_s14   ;;  %s1000_s13 = sphi %s1066_s13, %s1330_s13   ;;  %s996_s12 = sphi %s1064_s12, %s1329_s12  }
   0xa   : > { %1318 = sst [smem:[#allocation10_spill]] %s1032_s21  ;;  %s698_s24 = sadd.s32 4294967294, %s1036_s22  }
   0xb   : > { %s28_s25 = sadd.s32 1, %s1028_s20  ;;  %s31_s26 = sadd.s32 1, %s1032_s21 }
   0xc   : > { %p29_p0 = scmp.ge.s32.totalorder %s28_s25, 2  ;;  %s38_s27 = sadd.s32 1, %s1016_s17 }
   0xd   : > { %p45_p1 = scmp.ne.s32.totalorder %s1016_s17, %s1012_s16  ;;  %p46_p2 = scmp.eq.s32.totalorder %s1036_s22, 0 }
   0xe   : > { %s1336_s25 = smov (%p29_p0, %s28_s25), 0  ;;  %s1338_s26 = smov (!%p29_p0, %s31_s26), %s1032_s21 }
   0xf   : > { %1319 = sst [smem:[#allocation11_spill]] %s1336_s25  ;;  %p1128_p3 = por %p46_p2, %p45_p1 }
  0x10   : > { %p51_p4 = scmp.ne.s32.totalorder %s1012_s16, %s1008_s15  ;;  %p33_p5 = scmp.ge.s32.totalorder %s1338_s26, 2 }
  0x11   : > { %p52_p6 = scmp.eq.s32.totalorder %s697_s23, 0  ;;  %s104_s29 = ssub.s32 %s1028_s20, %s1336_s25 }
  0x12   : > { %s108_s30 = sadd.s32 1, %s1004_s14  ;;  %s1340_s26 = smov (%p33_p5, %s1338_s26), 0 }
  0x13   : > { %1321 = sst [smem:[#allocation12_spill]] %s1340_s26  ;;  %p1138_p7 = por %p52_p6, %p51_p4 }
  0x14   : > { %p118_p8 = scmp.ne.s32.totalorder %s1004_s14, %s1000_s13  ;;  %s35_s5 = ssub.s32 %s1032_s21, %s1340_s26 }
  0x15   : > { %p119_p9 = scmp.eq.s32.totalorder %s697_s23, 3  ;;  %p36_p10 = scmp.eq.s32.totalorder %s35_s5, 0 }
  0x16   : > { %s105_s6 = sor.u32 %s104_s29, %s35_s5  ;;  %p124_p13 = scmp.ne.s32.totalorder %s1000_s13, %s996_s12 }
  0x17   : > { %p106_p11 = scmp.eq.s32.totalorder %s105_s6, 0  ;;  %p1146_p12 = por %p119_p9, %p118_p8 }
  0x18   : > { %s1151_s8 = scalar_select %p36_p10, %s1016_s17, %s38_s27  }
  0x19   : > { %s1154_s9 = scalar_select %p106_p11, %s1004_s14, %s108_s30  }
  0x1a   : > { %p125_p0 = scmp.eq.s32.totalorder %s698_s24, 3  ;;  %p786_p1 = scmp.lt.s32.totalorder %s1036_s22, 4 }
  0x1b   : > { %s151_s11 = sand.u32 1, %s1016_s17   ;;  %s766_s23 = sshll.u32 %s1032_s21, 5 }
  0x1c   : > { %p1159_p2 = por %p125_p0, %p124_p13  ;;  %s701_s15 = sshll.u32 %s151_s11, 5 }
  0x1d   : > { %s160_s6 = scalar_lea.hbm %s1309_s0, %s766_s23  ;;  %s155_s27 = scalar_lea.vmem [#allocation3], %s701_s15 }
  0x1e   : > { %s163_s26 = sshll.u32 %s155_s27, 4  ;;  %s161_s25 = sshll.u32 %s160_s6, 4  ;;  %s164_s26 = int_to_ptr.vmem [resolvable:$true] %s163_s26  ;;  %s162_s25 = int_to_ptr.hbm [resolvable:$true] %s161_s25 }
  0x1f   : > { %p779_p4 = pnand %p786_p1, %p1128_p3  ;;  %p704_p5 = scmp.ge.s32.totalorder %s1036_s22, 1 }
  0x20   : > { %s152_s24 = scalar_lea.sflag [#allocation4], %s151_s11  ;;  %s1038_s30 = smov 128  }
  0x21   : > { %s1039_s20 = smov 8   ;;  %p171_p6 = scmp.lt.s32.totalorder %s1036_s22, 5 }
  0x22   : > { %781 = dma.hbm_to_vmem [thread:$0]  (!%p779_p4), %s162_s25, 512, %s164_s26, %s152_s24, %s1038_s30, %s1038_s30, %s1039_s20  }
  0x23   : > { %p172_p8 = pnand %p704_p5, %p171_p6 }
  0x24   : > { %s177_s21 = sand.u32 (!%p172_p8), 1, %s1012_s16  }
  0x25   : > { %175 = sbr.rel (%p172_p8) target bundleno = 741 (0x2e5), region = 32  ;;  %s705_s29 = sshll.u32 (!%p172_p8), %s177_s21, 5 }
  0x26   : > { %s178_s23 = scalar_lea.sflag (!%p172_p8), [#allocation4], %s177_s21  ;;  %s181_s15 = scalar_lea.vmem (!%p172_p8), [#allocation3], %s705_s29 }
  0x2a   : > { %987 = dma.done.wait (%p1138_p7), %s178_s23, 512  }
  0x2b   : > { %989 = vsyncadd (%p1138_p7), %s178_s23, 4294966784  ;;  %s202_s28 = sand.u32 1, %s1000_s13   ;;  %p707_p3 = scmp.ne.s32.totalorder %s1020_s18, 0 }
  0x2c   : > { %s706_s11 = sshll.u32 %s202_s28, 8 }
  0x2d   : > { %s1180_s20 = scalar_lea.vmem [#allocation6], %s706_s11  ;;  %209 = sbr.rel (%p707_p3) target bundleno = 195 (0xc3), region = 40 }
  0x32   : > { %v718_v0 = vld [vmem:[%s181_s15 + $0x10] sm:$0xf]  ;;  %v770_v1 = vld [vmem:[%s181_s15 + $0x14] sm:$0xf0]  ;;  %v769_v2 = vld [vmem:[%s181_s15 + $0x14] sm:$0xf] }
  0x33   : > { %v719_v3 = vor.u32 %v770_v1, %v718_v0  ;;  %v720_v4 = vld [vmem:[%s181_s15 + $0x18] sm:$0xf0]  ;;  %v710_v5 = vld [vmem:[%s181_s15] sm:$0xf]  ;;  %v768_v6 = vld [vmem:[%s181_s15 + $0x4] sm:$0xf0] }
  0x34   : > { %v723_v7 = vor.u32 %v769_v2, %v720_v4  ;;  %v767_v8 = vld [vmem:[%s181_s15 + $0x4] sm:$0xf]  ;;  %v712_v9 = vld [vmem:[%s181_s15 + $0x8] sm:$0xf0]  ;;  %v711_v10 = vor.u32 %v768_v6, %v710_v5  ;;  %v215_v11 = vld [vmem:[%s1311_s2] sm:$0xff]  ;;  %v1040_v13 = vmov 0  }
  0x35   : > { %251 = vmatpush.bf16.msra.mxu0 %v719_v3  ;;  %v715_v12 = vor.u32 %v767_v8, %v712_v9  ;;  %883 = vset.pattern.permute.xlu0 %v1040_v13  ;;  %v210_v14 = vld [vmem:[%s1310_s1] sm:$0xf]  ;;  %vm241_vm0 = vcmask 261120  }
  0x36   : > { %264 = vmatpush.bf16.msra.mxu1 %v723_v7  ;;  %218 = vperm.xlu0 %883, %v215_v11  }
  0x39   : > { %252 = vmatpush.bf16.msra.mxu0 %v711_v10 }
  0x3a   : > { %265 = vmatpush.bf16.msra.mxu1 %v715_v12 }
  0x3c   : > { %724 = vmatmul.msk.bf16.vlgmr.msra.gmra.mxu0 %vm241_vm0, %v210_v14 }
  0x3d   : > { %725 = vmatmul.msk.bf16.vlgmr.msra.gmra.mxu1 %vm241_vm0, %v210_v14 }
  0xa8   : > { %v219_v15 = vpop.permute.xlu0 %218 }
  0xb9   : > { %v254_v16 = vpop.f32.mrf.mxu0 }
  0xba   : > { %v255_v17 = vadd.f32 %v254_v16, %v219_v15  ;;  %v267_v18 = vpop.f32.mrf.mxu1 }
  0xbb   : > { %v268_v19 = vadd.f32 %v267_v18, %v219_v15 }
  0xbc   : > { %271 = vst [vmem:[#allocation2] sm:$0xff] %v255_v17 }
  0xbd   : > { %272 = vst [vmem:[#allocation2 + $0x8] sm:$0xff] %v268_v19 }
  0xc1   : > { %v256_v20 = vpop.f32.mrf.mxu0 }
  0xc2   : > { %v269_v21 = vpop.f32.mrf.mxu1 }
  0xc3 PF: > { %s726_s5 = sshll.u32 %s1020_s18, 7  ;;  %vm444_vm1 = vcmask 1043456   ;;  %v273_v25 = vld [vmem:[#allocation2] sm:$0xf]  ;;  %vm347_vm2 = vcmask 31744   ;;  %s762_s30 = sshll.u32 %s1024_s19, 6 }
  0xc4   : > { %v274_v22 = vld [vmem:[#allocation2 + $0x8] sm:$0xf]  ;;  %s276_s6 = sshra.s32 %s726_s5, 7  ;;  %s603_s29 = sadd.s32 %s1020_s18, %s762_s30 }
  0xc5   : > { %313 = vxpose.xlu0.b32.start.end [1/1] (short) %v274_v22, 128  ;;  %s727_s27 = sshll.u32 %s276_s6, 3  ;;  %s763_s23 = sshll.u32 %s603_s29, 3 }
  0xc6   : > { %s279_s24 = scalar_lea.vmem [#allocation2], %s727_s27  ;;  %s605_s21 = scalar_lea.hbm %s1312_s3, %s763_s23 }
  0xc7   : > { %v280_v23 = vld [vmem:[%s279_s24] sm:$0xf0]  ;;  %s606_s25 = sshll.u32 %s1180_s20, 4  ;;  %s608_s26 = sshll.u32 %s605_s21, 4  ;;  %s607_s25 = int_to_ptr.vmem [resolvable:$true] %s606_s25  ;;  %s609_s26 = int_to_ptr.hbm [resolvable:$true] %s608_s26 }
  0xc8   : > { %v346_v24 = vrot.slane %v280_v23, 4  ;;  %s593_s4 = scalar_lea.sflag [#allocation5], %s202_s28  ;;  %s928_s19 = sshra.s32 %s609_s26, 4  ;;  %s929_s19 = int_to_ptr.hbm [resolvable:$true] %s928_s19 }
  0xc9   : > { %s930_s5 = scalar_lea.hbm %s929_s19, 256  ;;  %s934_s27 = scalar_lea.hbm %s1312_s3, 1024 }
  0xca   : > { %772 = vmatpush.msk.msra.mxu2 %vm444_vm1, %v346_v24  ;;  %773 = vmatpush.msk.msra.mxu3 %vm444_vm1, %v346_v24  ;;  %p931_p7 = scmp.ne.s32.totalorder %s929_s19, %s930_s5  ;;  %p935_p11 = scmp.lt.s32.totalorder %s929_s19, %s1312_s3 }
  0xcb   : > { %728 = vmatpush.msk.msra.mxu0 %vm444_vm1, %v346_v24  ;;  %771 = vmatpush.msk.msra.mxu1 %vm444_vm1, %v346_v24  ;;  %p936_p13 = scmp.lt.s32.totalorder %s934_s27, %s930_s5 }
  0xcc   : > { %p932_p9 = pnand %p931_p7, %p1146_p12 }
  0xcd   : > { %p937_p0 = por %p936_p13, %p935_p11 }
  0xce   : > { %p933_p10 = pneg %p932_p9 }
  0xd0   : > { %p938_p1 = pnand %p937_p0, %p933_p10 }
 0x145   : > { %281 = vxpose.xlu0.b32.start.end [1/1] (short) %v273_v25, 128 }
 0x169   : > { %v329_v26 = vpop.trf.xlu0 }
 0x16a   : > { %745 = vmatmul.msk.f32.vlgmr.msra.gmra.mxu2 %vm347_vm2, %v329_v26 }
 0x171   : > { %v330_v27 = vpop.trf.xlu0 }
 0x172   : > { %746 = vmatmul.msk.f32.gmra.mxu2 %vm347_vm2, %v330_v27 }
 0x179   : > { %v331_v28 = vpop.trf.xlu0 }
 0x17a   : > { %747 = vmatmul.msk.f32.gmra.mxu2 %vm347_vm2, %v331_v28 }
 0x181   : > { %v332_v29 = vpop.trf.xlu0 }
 0x182   : > { %748 = vmatmul.msk.f32.gmra.mxu2 %vm347_vm2, %v332_v29 }
 0x189   : > { %v333_v30 = vpop.trf.xlu0 }
 0x18a   : > { %749 = vmatmul.msk.f32.gmra.mxu2 %vm347_vm2, %v333_v30 }
 0x191   : > { %v334_v31 = vpop.trf.xlu0 }
 0x192   : > { %750 = vmatmul.msk.f32.gmra.mxu2 %vm347_vm2, %v334_v31 }
 0x199   : > { %v335_v32 = vpop.trf.xlu0 }
 0x19a   : > { %751 = vmatmul.msk.f32.gmra.mxu2 %vm347_vm2, %v335_v32 }
 0x1a1   : > { %v336_v33 = vpop.trf.xlu0 }
 0x1a2   : > { %752 = vmatmul.msk.f32.gmra.mxu2 %vm347_vm2, %v336_v33 }
 0x1a9   : > { %v337_v34 = vpop.trf.xlu0 }
 0x1aa   : > { %753 = vmatmul.msk.f32.vlgmr.msra.gmra.mxu3 %vm347_vm2, %v337_v34 }
 0x1b1   : > { %v338_v35 = vpop.trf.xlu0 }
 0x1b2   : > { %754 = vmatmul.msk.f32.gmra.mxu3 %vm347_vm2, %v338_v35 }
 0x1b9   : > { %v339_v36 = vpop.trf.xlu0 }
 0x1ba   : > { %755 = vmatmul.msk.f32.gmra.mxu3 %vm347_vm2, %v339_v36 }
 0x1c1   : > { %v340_v37 = vpop.trf.xlu0 }
 0x1c2   : > { %756 = vmatmul.msk.f32.gmra.mxu3 %vm347_vm2, %v340_v37 }
 0x1c9   : > { %v341_v38 = vpop.trf.xlu0 }
 0x1ca   : > { %757 = vmatmul.msk.f32.gmra.mxu3 %vm347_vm2, %v341_v38 }
 0x1d1   : > { %v342_v39 = vpop.trf.xlu0 }
 0x1d2   : > { %758 = vmatmul.msk.f32.gmra.mxu3 %vm347_vm2, %v342_v39 }
 0x1d9   : > { %v343_v40 = vpop.trf.xlu0 }
 0x1da   : > { %759 = vmatmul.msk.f32.gmra.mxu3 %vm347_vm2, %v343_v40 }
 0x1e1   : > { %v344_v41 = vpop.trf.xlu0 }
 0x1e2   : > { %760 = vmatmul.msk.f32.gmra.mxu3 %vm347_vm2, %v344_v41 }
 0x1e9   : > { %v297_v42 = vpop.trf.xlu0 }
 0x1ea   : > { %729 = vmatmul.msk.f32.vlgmr.msra.gmra.mxu0 %vm347_vm2, %v297_v42 }
 0x1ed   : > { %v512_v43 = vpop.f32.mrf.mxu2 }
 0x1ee   : > { %576 = vst [vmem:[%s1180_s20 + $0x80] sm:$0xff] %v512_v43 }
 0x1f1   : > { %v298_v44 = vpop.trf.xlu0 }
 0x1f2   : > { %730 = vmatmul.msk.f32.gmra.mxu0 %vm347_vm2, %v298_v44 }
 0x1f5   : > { %v515_v45 = vpop.f32.mrf.mxu2 }
 0x1f6   : > { %577 = vst [vmem:[%s1180_s20 + $0x88] sm:$0xff] %v515_v45 }
 0x1f9   : > { %v299_v46 = vpop.trf.xlu0 }
 0x1fa   : > { %731 = vmatmul.msk.f32.gmra.mxu0 %vm347_vm2, %v299_v46 }
 0x1fd   : > { %v518_v47 = vpop.f32.mrf.mxu2 }
 0x1fe   : > { %578 = vst [vmem:[%s1180_s20 + $0x90] sm:$0xff] %v518_v47 }
 0x201   : > { %v300_v48 = vpop.trf.xlu0 }
 0x202   : > { %732 = vmatmul.msk.f32.gmra.mxu0 %vm347_vm2, %v300_v48 }
 0x205   : > { %v521_v49 = vpop.f32.mrf.mxu2 }
 0x206   : > { %579 = vst [vmem:[%s1180_s20 + $0x98] sm:$0xff] %v521_v49 }
 0x209   : > { %v301_v50 = vpop.trf.xlu0 }
 0x20a   : > { %733 = vmatmul.msk.f32.gmra.mxu0 %vm347_vm2, %v301_v50 }
 0x20d   : > { %v524_v51 = vpop.f32.mrf.mxu2 }
 0x20e   : > { %580 = vst [vmem:[%s1180_s20 + $0xa0] sm:$0xff] %v524_v51 }
 0x211   : > { %v302_v52 = vpop.trf.xlu0 }
 0x212   : > { %734 = vmatmul.msk.f32.gmra.mxu0 %vm347_vm2, %v302_v52 }
 0x215   : > { %v527_v53 = vpop.f32.mrf.mxu2 }
 0x216   : > { %581 = vst [vmem:[%s1180_s20 + $0xa8] sm:$0xff] %v527_v53 }
 0x219   : > { %v303_v54 = vpop.trf.xlu0 }
 0x21a   : > { %735 = vmatmul.msk.f32.gmra.mxu0 %vm347_vm2, %v303_v54 }
 0x21d   : > { %v530_v55 = vpop.f32.mrf.mxu2 }
 0x21e   : > { %582 = vst [vmem:[%s1180_s20 + $0xb0] sm:$0xff] %v530_v55 }
 0x221   : > { %v304_v56 = vpop.trf.xlu0 }
 0x222   : > { %736 = vmatmul.msk.f32.gmra.mxu0 %vm347_vm2, %v304_v56 }
 0x225   : > { %v533_v57 = vpop.f32.mrf.mxu2 }
 0x226   : > { %583 = vst [vmem:[%s1180_s20 + $0xb8] sm:$0xff] %v533_v57 }
 0x229   : > { %v305_v58 = vpop.trf.xlu0 }
 0x22a   : > { %737 = vmatmul.msk.f32.vlgmr.msra.gmra.mxu1 %vm347_vm2, %v305_v58 }
 0x22d   : > { %v536_v59 = vpop.f32.mrf.mxu3 }
 0x22e   : > { %584 = vst [vmem:[%s1180_s20 + $0xc0] sm:$0xff] %v536_v59 }
 0x231   : > { %v306_v60 = vpop.trf.xlu0 }
 0x232   : > { %738 = vmatmul.msk.f32.gmra.mxu1 %vm347_vm2, %v306_v60 }
 0x235   : > { %v539_v61 = vpop.f32.mrf.mxu3 }
 0x236   : > { %585 = vst [vmem:[%s1180_s20 + $0xc8] sm:$0xff] %v539_v61 }
 0x239   : > { %v307_v62 = vpop.trf.xlu0 }
 0x23a   : > { %739 = vmatmul.msk.f32.gmra.mxu1 %vm347_vm2, %v307_v62 }
 0x23d   : > { %v542_v63 = vpop.f32.mrf.mxu3 }
 0x23e   : > { %586 = vst [vmem:[%s1180_s20 + $0xd0] sm:$0xff] %v542_v63 }
 0x241   : > { %v308_v0 = vpop.trf.xlu0 }
 0x242   : > { %740 = vmatmul.msk.f32.gmra.mxu1 %vm347_vm2, %v308_v0 }
 0x245   : > { %v545_v1 = vpop.f32.mrf.mxu3 }
 0x246   : > { %587 = vst [vmem:[%s1180_s20 + $0xd8] sm:$0xff] %v545_v1 }
 0x249   : > { %v309_v2 = vpop.trf.xlu0 }
 0x24a   : > { %741 = vmatmul.msk.f32.gmra.mxu1 %vm347_vm2, %v309_v2 }
 0x24d   : > { %v548_v3 = vpop.f32.mrf.mxu3 }
 0x24e   : > { %588 = vst [vmem:[%s1180_s20 + $0xe0] sm:$0xff] %v548_v3 }
 0x251   : > { %v310_v4 = vpop.trf.xlu0 }
 0x252   : > { %742 = vmatmul.msk.f32.gmra.mxu1 %vm347_vm2, %v310_v4 }
 0x255   : > { %v551_v5 = vpop.f32.mrf.mxu3 }
 0x256   : > { %589 = vst [vmem:[%s1180_s20 + $0xe8] sm:$0xff] %v551_v5 }
 0x259   : > { %v311_v6 = vpop.trf.xlu0 }
 0x25a   : > { %743 = vmatmul.msk.f32.gmra.mxu1 %vm347_vm2, %v311_v6 }
 0x25d   : > { %v554_v7 = vpop.f32.mrf.mxu3 }
 0x25e   : > { %590 = vst [vmem:[%s1180_s20 + $0xf0] sm:$0xff] %v554_v7 }
 0x261   : > { %v312_v8 = vpop.trf.xlu0 }
 0x262   : > { %744 = vmatmul.msk.f32.gmra.mxu1 %vm347_vm2, %v312_v8 }
 0x265   : > { %v557_v9 = vpop.f32.mrf.mxu3 }
 0x266   : > { %591 = vst [vmem:[%s1180_s20 + $0xf8] sm:$0xff] %v557_v9 }
 0x267   : > { %v464_v10 = vpop.f32.mrf.mxu0 }
 0x268   : > { %560 = vst [vmem:[%s1180_s20] sm:$0xff] %v464_v10 }
 0x26f   : > { %v467_v11 = vpop.f32.mrf.mxu0 }
 0x270   : > { %561 = vst [vmem:[%s1180_s20 + $0x8] sm:$0xff] %v467_v11 }
 0x277   : > { %v470_v12 = vpop.f32.mrf.mxu0 }
 0x278   : > { %562 = vst [vmem:[%s1180_s20 + $0x10] sm:$0xff] %v470_v12 }
 0x27f   : > { %v473_v13 = vpop.f32.mrf.mxu0 }
 0x280   : > { %563 = vst [vmem:[%s1180_s20 + $0x18] sm:$0xff] %v473_v13 }
 0x287   : > { %v476_v14 = vpop.f32.mrf.mxu0 }
 0x288   : > { %564 = vst [vmem:[%s1180_s20 + $0x20] sm:$0xff] %v476_v14 }
 0x28f   : > { %v479_v15 = vpop.f32.mrf.mxu0 }
 0x290   : > { %565 = vst [vmem:[%s1180_s20 + $0x28] sm:$0xff] %v479_v15 }
 0x297   : > { %v482_v16 = vpop.f32.mrf.mxu0 }
 0x298   : > { %566 = vst [vmem:[%s1180_s20 + $0x30] sm:$0xff] %v482_v16 }
 0x29f   : > { %v485_v17 = vpop.f32.mrf.mxu0 }
 0x2a0   : > { %567 = vst [vmem:[%s1180_s20 + $0x38] sm:$0xff] %v485_v17 }
 0x2a7   : > { %v488_v18 = vpop.f32.mrf.mxu1 }
 0x2a8   : > { %568 = vst [vmem:[%s1180_s20 + $0x40] sm:$0xff] %v488_v18 }
 0x2af   : > { %v491_v19 = vpop.f32.mrf.mxu1 }
 0x2b0   : > { %569 = vst [vmem:[%s1180_s20 + $0x48] sm:$0xff] %v491_v19 }
 0x2b7   : > { %v494_v20 = vpop.f32.mrf.mxu1 }
 0x2b8   : > { %570 = vst [vmem:[%s1180_s20 + $0x50] sm:$0xff] %v494_v20 }
 0x2bf   : > { %v497_v21 = vpop.f32.mrf.mxu1 }
 0x2c0   : > { %571 = vst [vmem:[%s1180_s20 + $0x58] sm:$0xff] %v497_v21 }
 0x2c7   : > { %v500_v22 = vpop.f32.mrf.mxu1 }
 0x2c8   : > { %572 = vst [vmem:[%s1180_s20 + $0x60] sm:$0xff] %v500_v22 }
 0x2cf   : > { %v503_v23 = vpop.f32.mrf.mxu1 }
 0x2d0   : > { %573 = vst [vmem:[%s1180_s20 + $0x68] sm:$0xff] %v503_v23 }
 0x2d7   : > { %v506_v24 = vpop.f32.mrf.mxu1 }
 0x2d8   : > { %574 = vst [vmem:[%s1180_s20 + $0x70] sm:$0xff] %v506_v24 }
 0x2df   : > { %v509_v25 = vpop.f32.mrf.mxu1 }
 0x2e0   : > { %575 = vst [vmem:[%s1180_s20 + $0x78] sm:$0xff] %v509_v25 }
 0x2e1   : > { %941 = shalt.err (!%p938_p1)
}
 0x2e2   : > { %s1041_s28 = smov 128   ;;  %s1042_s20 = smov 256  }
 0x2e3   : > { %s1043_s29 = smov 8  }
 0x2e4   : > { %776 = dma.vmem_to_hbm [thread:$0]  (%p1146_p12), %s607_s25, 4096, %s609_s26, %s593_s4, %s1041_s28, %s1042_s20, %s1043_s29  }
 0x2e5 PF: > { %p787_p4 = scmp.ge.s32.totalorder %s1036_s22, 2  ;;  %s623_s23 = sand.u32 1, %s996_s12  }
 0x2e6   : > { %s624_s15 = scalar_lea.sflag [#allocation5], %s623_s23 }
 0x2e7   : > { %p783_p5 = pnand %p787_p4, %p1159_p2 }
 0x2e9   : > { %p784_p6 = pneg %p783_p5 }
 0x2eb   : > { %991 = dma.done.wait (%p784_p6), %s624_s15, 4096  }
 0x2ec   : > { %993 = vsyncadd (%p784_p6), %s624_s15, 4294963200  ;;  %s19_s22 = sadd.s32 1, %s1036_s22   ;;  %s1325_s18 = sld [smem:[#allocation9_spill]] }
 0x2ed   : > { %p16_p8 = scmp.ge.s32.totalorder %s19_s22, 6   ;;  %s1326_s19 = sld [smem:[#allocation10_spill]] }
 0x2ee   : > { %s1327_s20 = sld [smem:[#allocation11_spill]]  ;;  %s1329_s12 = smov %s1000_s13 }
 0x2ef   : > { %s1328_s21 = sld [smem:[#allocation12_spill]]  ;;  %s1330_s13 = smov %s1004_s14 }
 0x2f0   : > { %s1331_s14 = smov %s1154_s9  ;;  %s1332_s15 = smov %s1012_s16 }
 0x2f1   : > { %s1333_s16 = smov %s1016_s17  ;;  %s1334_s17 = smov %s1151_s8 }
 0x2f2   :  { %18 = sbr.rel (!%p16_p8) target bundleno = 9 (0x9), region = 82 }
 0x2f7   :  { %630 = vsyncpa [#allocation4], 1 }
 0x2f8   :  { %632 = vsyncpa [#allocation4 + $0x1], 1 }
 0x2f9   :  { %633 = vsyncpa [#allocation5], 1 }
 0x2fa   :  { %635 = vsyncpa [#allocation5 + $0x1], 1 }

</bundles_post_ra>
